<compile_context>
chip_gen: v7x
topology: tpu7x:2x2x1
jax: 0.10.0
libtpu: 0.0.40
codegen_flags: <defaults>
</compile_context>

<pallas_src>
import jax
import jax.numpy as jnp
from jax.experimental import pallas as pl
from jax.experimental.pallas import tpu as pltpu


def _round_up(n, m):
    return ((n + m - 1) // m) * m


def latent_reward_kernel(x_ref,
                         w1_ref, b1_ref,
                         w2_ref, b2_ref,
                         w3_ref, b3_ref,
                         w4_ref, b4_ref,
                         o_ref):
    # Layer 1: bf16 matmul on the MXU, f32 accumulation; bias/ReLU in f32.
    h = jnp.dot(x_ref[...], w1_ref[...], preferred_element_type=jnp.float32)
    h = jnp.maximum(h + b1_ref[...], 0.0)

    # Layer 2.
    h = jnp.dot(h.astype(jnp.bfloat16), w2_ref[...],
                preferred_element_type=jnp.float32)
    h = jnp.maximum(h + b2_ref[...], 0.0)

    # Layer 3.
    h = jnp.dot(h.astype(jnp.bfloat16), w3_ref[...],
                preferred_element_type=jnp.float32)
    h = jnp.maximum(h + b3_ref[...], 0.0)

    # Final hidden -> 1 layer: an N=1 matmul wastes a full MXU pass, so do it
    # on the VPU (elementwise mul) + XLU (lane reduction) instead.
    y = jnp.sum(h * w4_ref[...], axis=-1, keepdims=True) + b4_ref[...]

    o_ref[...] = jnp.tanh(y)


def latent_reward_forward(x, params, block_rows=2048):
    """x: [B, input_dim] float32 -> [B, 1] float32."""
    (w1, b1), (w2, b2), (w3, b3), (w4, b4) = params
    B, input_dim = x.shape
    hidden_dim = w1.shape[1]
    out_dim = w4.shape[1]

    # bf16 storage for the MXU operands; everything else stays f32.
    x_bf = x.astype(jnp.bfloat16)
    w1_bf = w1.astype(jnp.bfloat16)
    w2_bf = w2.astype(jnp.bfloat16)
    w3_bf = w3.astype(jnp.bfloat16)
    # Final layer weight as a (1, hidden) f32 row for the VPU reduce path.
    w4_row = w4.reshape(1, hidden_dim).astype(jnp.float32)
    b4_2d = b4.reshape(1, out_dim).astype(jnp.float32)

    # Batch tile: multiple of 16 (bf16 sublane packing); cap at block_rows so
    # per-buffer VMEM stays small (~1 MiB at TB=2048) on every generation
    # including v7x's 64 MiB VMEM / 32 MiB default scoped limit.
    tb = min(block_rows, _round_up(max(B, 1), 16))
    tb = _round_up(tb, 16)
    padded_B = _round_up(B, tb)
    if padded_B != B:
        x_bf = jnp.pad(x_bf, ((0, padded_B - B), (0, 0)))

    grid = (padded_B // tb,)

    const = lambda i: (0, 0)  # weights/biases: same full-array block every step

    out = pl.pallas_call(
        latent_reward_kernel,
        out_shape=jax.ShapeDtypeStruct((padded_B, out_dim), jnp.float32),
        grid=grid,
        in_specs=[
            pl.BlockSpec((tb, input_dim), lambda i: (i, 0)),          # x tile
            pl.BlockSpec((input_dim, hidden_dim), const),             # w1
            pl.BlockSpec((1, hidden_dim), const),                     # b1
            pl.BlockSpec((hidden_dim, hidden_dim), const),            # w2
            pl.BlockSpec((1, hidden_dim), const),                     # b2
            pl.BlockSpec((hidden_dim, hidden_dim), const),            # w3
            pl.BlockSpec((1, hidden_dim), const),                     # b3
            pl.BlockSpec((1, hidden_dim), const),                     # w4 (row)
            pl.BlockSpec((1, out_dim), const),                        # b4
        ],
        out_specs=pl.BlockSpec((tb, out_dim), lambda i: (i, 0)),
        compiler_params=pltpu.CompilerParams(
            dimension_semantics=("parallel",)),
    )(x_bf, w1_bf, b1, w2_bf, b2, w3_bf, b3, w4_row, b4_2d)

    return out[:B]


def init_params(key, input_dim=23, hidden_dim=64, output_dim=1):
    """Deterministic synthetic parameters. Weights stored [in, out]."""
    sizes = [input_dim, hidden_dim, hidden_dim, hidden_dim, output_dim]
    params = []
    for j in range(len(sizes) - 1):
        key, kw, kb = jax.random.split(key, 3)
        fan_in = sizes[j]
        bound = 1.0 / jnp.sqrt(fan_in)  # mimic nn.Linear default init range
        w = jax.random.uniform(kw, (sizes[j], sizes[j + 1]),
                               minval=-bound, maxval=bound, dtype=jnp.float32)
        b = jax.random.uniform(kb, (1, sizes[j + 1]),
                               minval=-bound, maxval=bound, dtype=jnp.float32)
        params.append((w, b))
    return params


def reference_forward(x, params):
    (w1, b1), (w2, b2), (w3, b3), (w4, b4) = params
    h = jnp.maximum(x @ w1 + b1, 0.0)
    h = jnp.maximum(h @ w2 + b2, 0.0)
    h = jnp.maximum(h @ w3 + b3, 0.0)
    y = h @ w4 + b4
    return jnp.tanh(y)


if __name__ == "__main__":
    key = jax.random.PRNGKey(0)
    key, kx = jax.random.split(key)

    B, input_dim, hidden_dim, output_dim = 8, 23, 64, 1
    x = jax.random.normal(kx, (B, input_dim), dtype=jnp.float32)
    params = init_params(key, input_dim, hidden_dim, output_dim)

    out = latent_reward_forward(x, params)
    out = jax.block_until_ready(out)

    ref = reference_forward(x, params)
    assert out.shape == (B, output_dim), out.shape
    # bf16 matmul inputs (f32 accumulation) -> loosened tolerance vs f32 ref.
    max_err = jnp.max(jnp.abs(out - ref))
    assert jnp.allclose(out, ref, atol=3e-2, rtol=3e-2), f"max abs err {max_err}"

    print("KERNEL_OK")
</pallas_src>

<mosaic_0001>
module attributes {stable_mosaic.version = 11 : i64} {
  func.func @latent_reward_kernel(%arg0: i32, %arg1: memref<16x23xbf16, #tpu.memory_space<vmem>>, %arg2: memref<23x64xbf16, #tpu.memory_space<vmem>>, %arg3: memref<1x64xf32, #tpu.memory_space<vmem>>, %arg4: memref<64x64xbf16, #tpu.memory_space<vmem>>, %arg5: memref<1x64xf32, #tpu.memory_space<vmem>>, %arg6: memref<64x64xbf16, #tpu.memory_space<vmem>>, %arg7: memref<1x64xf32, #tpu.memory_space<vmem>>, %arg8: memref<1x64xf32, #tpu.memory_space<vmem>>, %arg9: memref<1x1xf32, #tpu.memory_space<vmem>>, %arg10: memref<16x1xf32, #tpu.memory_space<vmem>>) attributes {dimension_semantics = [#tpu.dimension_semantics<parallel>], iteration_bounds = array<i64: 1>, scalar_prefetch = 0 : i64, scratch_operands = 0 : i64, tpu.core_type = #tpu.core_type<tc>, window_params = [{transform_indices = @transform_0, window_bounds = array<i64: 16, 23>}, {pipeline_mode = #tpu.pipeline_mode<synchronous>, transform_indices = @transform_1, window_bounds = array<i64: 23, 64>}, {pipeline_mode = #tpu.pipeline_mode<synchronous>, transform_indices = @transform_2, window_bounds = array<i64: 1, 64>}, {pipeline_mode = #tpu.pipeline_mode<synchronous>, transform_indices = @transform_3, window_bounds = array<i64: 64, 64>}, {pipeline_mode = #tpu.pipeline_mode<synchronous>, transform_indices = @transform_4, window_bounds = array<i64: 1, 64>}, {pipeline_mode = #tpu.pipeline_mode<synchronous>, transform_indices = @transform_5, window_bounds = array<i64: 64, 64>}, {pipeline_mode = #tpu.pipeline_mode<synchronous>, transform_indices = @transform_6, window_bounds = array<i64: 1, 64>}, {pipeline_mode = #tpu.pipeline_mode<synchronous>, transform_indices = @transform_7, window_bounds = array<i64: 1, 64>}, {pipeline_mode = #tpu.pipeline_mode<synchronous>, transform_indices = @transform_8, window_bounds = array<i64: 1, 1>}, {transform_indices = @transform_9, window_bounds = array<i64: 16, 1>}]} {
    %c0 = arith.constant 0 : index
    %c0_0 = arith.constant 0 : index
    %0 = vector.load %arg1[%c0, %c0_0] : memref<16x23xbf16, #tpu.memory_space<vmem>>, vector<16x23xbf16>
    %c0_1 = arith.constant 0 : index
    %c0_2 = arith.constant 0 : index
    %1 = vector.load %arg2[%c0_1, %c0_2] : memref<23x64xbf16, #tpu.memory_space<vmem>>, vector<23x64xbf16>
    %cst = arith.constant dense<0.000000e+00> : vector<16x64xf32>
    %2 = tpu.matmul %0, %1, %cst {dimension_numbers = #tpu.dot_dimension_numbers<[1], [0], [0], [1], [0, 0, 1, 1], [], []>} : vector<16x23xbf16>, vector<23x64xbf16>, vector<16x64xf32> -> vector<16x64xf32>
    %c0_3 = arith.constant 0 : index
    %c0_4 = arith.constant 0 : index
    %3 = vector.load %arg3[%c0_3, %c0_4] : memref<1x64xf32, #tpu.memory_space<vmem>>, vector<1x64xf32>
    %4 = vector.broadcast %3 : vector<1x64xf32> to vector<16x64xf32>
    %5 = arith.addf %2, %4 : vector<16x64xf32>
    %cst_5 = arith.constant 0.000000e+00 : f32
    %6 = vector.broadcast %cst_5 : f32 to vector<16x64xf32>
    %7 = arith.maximumf %5, %6 : vector<16x64xf32>
    %8 = arith.truncf %7 : vector<16x64xf32> to vector<16x64xbf16>
    %c0_6 = arith.constant 0 : index
    %c0_7 = arith.constant 0 : index
    %9 = vector.load %arg4[%c0_6, %c0_7] : memref<64x64xbf16, #tpu.memory_space<vmem>>, vector<64x64xbf16>
    %cst_8 = arith.constant dense<0.000000e+00> : vector<16x64xf32>
    %10 = tpu.matmul %8, %9, %cst_8 {dimension_numbers = #tpu.dot_dimension_numbers<[1], [0], [0], [1], [0, 0, 1, 1], [], []>} : vector<16x64xbf16>, vector<64x64xbf16>, vector<16x64xf32> -> vector<16x64xf32>
    %c0_9 = arith.constant 0 : index
    %c0_10 = arith.constant 0 : index
    %11 = vector.load %arg5[%c0_9, %c0_10] : memref<1x64xf32, #tpu.memory_space<vmem>>, vector<1x64xf32>
    %12 = vector.broadcast %11 : vector<1x64xf32> to vector<16x64xf32>
    %13 = arith.addf %10, %12 : vector<16x64xf32>
    %cst_11 = arith.constant 0.000000e+00 : f32
    %14 = vector.broadcast %cst_11 : f32 to vector<16x64xf32>
    %15 = arith.maximumf %13, %14 : vector<16x64xf32>
    %16 = arith.truncf %15 : vector<16x64xf32> to vector<16x64xbf16>
    %c0_12 = arith.constant 0 : index
    %c0_13 = arith.constant 0 : index
    %17 = vector.load %arg6[%c0_12, %c0_13] : memref<64x64xbf16, #tpu.memory_space<vmem>>, vector<64x64xbf16>
    %cst_14 = arith.constant dense<0.000000e+00> : vector<16x64xf32>
    %18 = tpu.matmul %16, %17, %cst_14 {dimension_numbers = #tpu.dot_dimension_numbers<[1], [0], [0], [1], [0, 0, 1, 1], [], []>} : vector<16x64xbf16>, vector<64x64xbf16>, vector<16x64xf32> -> vector<16x64xf32>
    %c0_15 = arith.constant 0 : index
    %c0_16 = arith.constant 0 : index
    %19 = vector.load %arg7[%c0_15, %c0_16] : memref<1x64xf32, #tpu.memory_space<vmem>>, vector<1x64xf32>
    %20 = vector.broadcast %19 : vector<1x64xf32> to vector<16x64xf32>
    %21 = arith.addf %18, %20 : vector<16x64xf32>
    %cst_17 = arith.constant 0.000000e+00 : f32
    %22 = vector.broadcast %cst_17 : f32 to vector<16x64xf32>
    %23 = arith.maximumf %21, %22 : vector<16x64xf32>
    %c0_18 = arith.constant 0 : index
    %c0_19 = arith.constant 0 : index
    %24 = vector.load %arg8[%c0_18, %c0_19] : memref<1x64xf32, #tpu.memory_space<vmem>>, vector<1x64xf32>
    %25 = vector.broadcast %24 : vector<1x64xf32> to vector<16x64xf32>
    %26 = arith.mulf %23, %25 : vector<16x64xf32>
    %cst_20 = arith.constant dense<0.000000e+00> : vector<16xf32>
    %27 = vector.multi_reduction <add>, %26, %cst_20 [1] : vector<16x64xf32> to vector<16xf32>
    %28 = vector.shape_cast %27 : vector<16xf32> to vector<16x1xf32>
    %c0_21 = arith.constant 0 : index
    %c0_22 = arith.constant 0 : index
    %29 = vector.load %arg9[%c0_21, %c0_22] : memref<1x1xf32, #tpu.memory_space<vmem>>, vector<1x1xf32>
    %30 = vector.broadcast %29 : vector<1x1xf32> to vector<16x1xf32>
    %31 = arith.addf %28, %30 : vector<16x1xf32>
    %32 = math.tanh %31 : vector<16x1xf32>
    %c0_23 = arith.constant 0 : index
    %c0_24 = arith.constant 0 : index
    %33 = vector.load %arg10[%c0_23, %c0_24] : memref<16x1xf32, #tpu.memory_space<vmem>>, vector<16x1xf32>
    tpu.vector_store %arg10[%c0_23, %c0_24], %32 {strides = array<i32>} : memref<16x1xf32, #tpu.memory_space<vmem>>, vector<16x1xf32>,
    return
  }
  func.func @transform_0(%arg0: i32) -> (i32, i32) {
    %c0_i32 = arith.constant 0 : i32
    %c0_i32_0 = arith.constant 0 : i32
    return %arg0, %c0_i32 : i32, i32
  }
  func.func @transform_1(%arg0: i32) -> (i32, i32) {
    %c0_i32 = arith.constant 0 : i32
    %c0_i32_0 = arith.constant 0 : i32
    %c0_i32_1 = arith.constant 0 : i32
    return %c0_i32, %c0_i32_0 : i32, i32
  }
  func.func @transform_2(%arg0: i32) -> (i32, i32) {
    %c0_i32 = arith.constant 0 : i32
    %c0_i32_0 = arith.constant 0 : i32
    %c0_i32_1 = arith.constant 0 : i32
    return %c0_i32, %c0_i32_0 : i32, i32
  }
  func.func @transform_3(%arg0: i32) -> (i32, i32) {
    %c0_i32 = arith.constant 0 : i32
    %c0_i32_0 = arith.constant 0 : i32
    %c0_i32_1 = arith.constant 0 : i32
    return %c0_i32, %c0_i32_0 : i32, i32
  }
  func.func @transform_4(%arg0: i32) -> (i32, i32) {
    %c0_i32 = arith.constant 0 : i32
    %c0_i32_0 = arith.constant 0 : i32
    %c0_i32_1 = arith.constant 0 : i32
    return %c0_i32, %c0_i32_0 : i32, i32
  }
  func.func @transform_5(%arg0: i32) -> (i32, i32) {
    %c0_i32 = arith.constant 0 : i32
    %c0_i32_0 = arith.constant 0 : i32
    %c0_i32_1 = arith.constant 0 : i32
    return %c0_i32, %c0_i32_0 : i32, i32
  }
  func.func @transform_6(%arg0: i32) -> (i32, i32) {
    %c0_i32 = arith.constant 0 : i32
    %c0_i32_0 = arith.constant 0 : i32
    %c0_i32_1 = arith.constant 0 : i32
    return %c0_i32, %c0_i32_0 : i32, i32
  }
  func.func @transform_7(%arg0: i32) -> (i32, i32) {
    %c0_i32 = arith.constant 0 : i32
    %c0_i32_0 = arith.constant 0 : i32
    %c0_i32_1 = arith.constant 0 : i32
    return %c0_i32, %c0_i32_0 : i32, i32
  }
  func.func @transform_8(%arg0: i32) -> (i32, i32) {
    %c0_i32 = arith.constant 0 : i32
    %c0_i32_0 = arith.constant 0 : i32
    %c0_i32_1 = arith.constant 0 : i32
    return %c0_i32, %c0_i32_0 : i32, i32
  }
  func.func @transform_9(%arg0: i32) -> (i32, i32) {
    %c0_i32 = arith.constant 0 : i32
    %c0_i32_0 = arith.constant 0 : i32
    return %arg0, %c0_i32 : i32, i32
  }
}

</mosaic_0001>

<bundles_post_ra>
// kernel: tpu_custom_call.1
= control target key start
LH: loop header
LB: loop body
LE: loop exit
PB: predicated region body
PF: predicated region fallthrough
CT: control target
= control target key end

     0   :  { %s722_s0 = inlined_call_operand.hbm [shape: bf16[16,23], index: 0, kind: input, shape index: {}]   ;;  %s723_s1 = inlined_call_operand.hbm [shape: bf16[23,64], index: 1, kind: input, shape index: {}]   ;;  %s724_s2 = inlined_call_operand.vmem [shape: f32[1,64], index: 2, kind: input, shape index: {}]   ;;  %s725_s3 = inlined_call_operand.hbm [shape: bf16[64,64], index: 3, kind: input, shape index: {}]   ;;  %s726_s4 = inlined_call_operand.vmem [shape: f32[1,64], index: 4, kind: input, shape index: {}]   ;;  %s727_s5 = inlined_call_operand.hbm [shape: bf16[64,64], index: 5, kind: input, shape index: {}]   ;;  %s728_s6 = inlined_call_operand.vmem [shape: f32[1,64], index: 6, kind: input, shape index: {}]   ;;  %s729_s7 = inlined_call_operand.vmem [shape: f32[1,64], index: 7, kind: input, shape index: {}]   ;;  %s730_s8 = inlined_call_operand.<no memory space> [shape: f32[1,1], index: 8, kind: input, shape index: {}]   ;;  %s731_s9 = inlined_call_operand.vmem [shape: f32[16,1], index: 9, kind: output, shape index: {}]  }
   0x1   :  { %v14_v0 = vstv %s730_s8 }
   0x2   :  { %15 = vst [vmem:[#allocation2] sm:$0x1] %v14_v0 }
   0x3   :  { %16 = vsyncpa [#allocation4], 0 }
   0x4   :  { %17 = vsyncpa [#allocation6], 0 }
   0x5   :  { %18 = vsyncpa [#allocation9], 0  ;;  %s561_s11 = smov [#allocation5]   ;;  %s562_s13 = smov [#allocation3]  }
   0x6   :  { %s36_s12 = sshll.u32 %s561_s11, 4  ;;  %s24_s14 = sshll.u32 %s562_s13, 4  ;;  %s37_s12 = int_to_ptr.vmem [resolvable:$true] %s36_s12  ;;  %s623_s14 = int_to_ptr.vmem [resolvable:$true] %s24_s14 }
   0x7   :  { %s467_s17 = scalar_lea.hbm %s723_s1, 192 }
   0x8   :  { %p468_p0 = scmp.ne.s32.totalorder %s723_s1, %s467_s17  ;;  %p471_p1 = scmp.lt.u32.totalorder %s467_s17, %s723_s1 }
   0xa   :  { %p473_p2 = pnand %p471_p1, %p468_p0 }
   0xc   :  { %476 = shalt.err (!%p473_p2)
}
   0xd   :  { %s477_s21 = scalar_lea.vmem %s37_s12, 192  ;;  %p482_p4 = scmp.lt.s32.totalorder %s37_s12, %s37_s12 }
   0xe   :  { %p478_p3 = scmp.ne.s32.totalorder %s37_s12, %s477_s21  ;;  %p483_p5 = scmp.lt.s32.totalorder %s477_s21, %s477_s21 }
  0x10   :  { %p484_p6 = por %p483_p5, %p482_p4 }
  0x12   :  { %p485_p7 = pnand %p484_p6, %p478_p3 }
  0x14   :  { %488 = shalt.err (!%p485_p7)
}
  0x15   :  { %s563_s22 = smov 64   ;;  %s564_s23 = smov 4  }
  0x16   :  { %42 = dma.hbm_to_vmem [thread:$0]  %s723_s1, 192, %s37_s12, [#allocation6], %s563_s22, %s563_s22, %s564_s23  }
  0x17   :  { %s489_s28 = scalar_lea.hbm %s722_s0, 128 }
  0x18   :  { %p490_p8 = scmp.ne.s32.totalorder %s722_s0, %s489_s28  ;;  %p493_p9 = scmp.lt.u32.totalorder %s489_s28, %s722_s0 }
  0x1a   :  { %p495_p10 = pnand %p493_p9, %p490_p8 }
  0x1c   :  { %498 = shalt.err (!%p495_p10)
}
  0x1d   :  { %s499_s13 = scalar_lea.vmem %s623_s14, 128  ;;  %p504_p12 = scmp.lt.s32.totalorder %s623_s14, %s623_s14 }
  0x1e   :  { %p500_p11 = scmp.ne.s32.totalorder %s623_s14, %s499_s13  ;;  %p505_p13 = scmp.lt.s32.totalorder %s499_s13, %s499_s13 }
  0x20   :  { %p506_p0 = por %p505_p13, %p504_p12 }
  0x22   :  { %p507_p1 = pnand %p506_p0, %p500_p11 }
  0x24   :  { %510 = shalt.err (!%p507_p1)
}
  0x25   :  { %30 = dma.hbm_to_vmem [thread:$0]  %s722_s0, 128, %s623_s14, [#allocation4], %s563_s22, %s563_s22, %s564_s23  }
  0x26   :  { %s565_s15 = smov [#allocation7]   ;;  %s566_s17 = smov [#allocation8]  }
  0x27   :  { %s50_s16 = sshll.u32 %s565_s15, 4  ;;  %s64_s18 = sshll.u32 %s566_s17, 4  ;;  %s51_s16 = int_to_ptr.vmem [resolvable:$true] %s50_s16  ;;  %s660_s18 = int_to_ptr.vmem [resolvable:$true] %s64_s18 }
  0x28   :  { %s511_s20 = scalar_lea.hbm %s725_s3, 512 }
  0x29   :  { %p512_p2 = scmp.ne.s32.totalorder %s725_s3, %s511_s20  ;;  %p515_p3 = scmp.lt.u32.totalorder %s511_s20, %s725_s3 }
  0x2b   :  { %p517_p4 = pnand %p515_p3, %p512_p2 }
  0x2d   :  { %520 = shalt.err (!%p517_p4)
}
  0x2e   :  { %s521_s0 = scalar_lea.vmem %s51_s16, 512  ;;  %p526_p6 = scmp.lt.s32.totalorder %s51_s16, %s51_s16 }
  0x2f   :  { %p522_p5 = scmp.ne.s32.totalorder %s51_s16, %s521_s0  ;;  %p527_p7 = scmp.lt.s32.totalorder %s521_s0, %s521_s0 }
  0x31   :  { %p528_p8 = por %p527_p7, %p526_p6 }
  0x33   :  { %p529_p9 = pnand %p528_p8, %p522_p5 }
  0x35   :  { %532 = shalt.err (!%p529_p9)
}
  0x36   :  { %56 = dma.hbm_to_vmem [thread:$0]  %s725_s3, 512, %s51_s16, [#allocation6], %s563_s22, %s563_s22, %s564_s23  }
  0x37   :  { %s533_s30 = scalar_lea.hbm %s727_s5, 512 }
  0x38   :  { %p534_p10 = scmp.ne.s32.totalorder %s727_s5, %s533_s30  ;;  %p537_p11 = scmp.lt.u32.totalorder %s533_s30, %s727_s5 }
  0x3a   :  { %p539_p12 = pnand %p537_p11, %p534_p10 }
  0x3c   :  { %542 = shalt.err (!%p539_p12)
}
  0x3d   :  { %s543_s12 = scalar_lea.vmem %s660_s18, 512  ;;  %p548_p0 = scmp.lt.s32.totalorder %s660_s18, %s660_s18 }
  0x3e   :  { %p544_p13 = scmp.ne.s32.totalorder %s660_s18, %s543_s12  ;;  %p549_p1 = scmp.lt.s32.totalorder %s543_s12, %s543_s12 }
  0x40   :  { %p550_p2 = por %p549_p1, %p548_p0 }
  0x42   :  { %p551_p3 = pnand %p550_p2, %p544_p13 }
  0x44   :  { %554 = shalt.err (!%p551_p3)
}
  0x45   :  { %70 = dma.hbm_to_vmem [thread:$0]  %s727_s5, 512, %s660_s18, [#allocation9], %s563_s22, %s563_s22, %s564_s23  }
  0x46   :  { %555 = dma.done.wait [#allocation4], 128  }
  0x47   :  { %556 = vsyncadd [#allocation4], 4294967168 }
  0x48   :  { %557 = dma.done.wait [#allocation6], 704  }
  0x49   :  { %558 = vsyncadd [#allocation6], 4294966592 }
  0x4a   :  { %559 = dma.done.wait [#allocation9], 512  }
  0x4b   :  { %560 = vsyncadd [#allocation9], 4294966784  ;;  %v567_v1 = vmov 0.0   ;;  %vm120_vm0 = vcmask 1042432   ;;  %vm568_vm1 = vmmov 0   ;;  %vm121_vm2 = vcmask 1043456  }
  0x4c   :  { %411 = vmatprep.subr.bf16.mxu0 %v567_v1  ;;  %419 = vmatprep.subr.bf16.mxu1 %v567_v1  ;;  %v569_v2 = vmov 65535   ;;  %v452_v4 = vld [vmem:[#allocation5] sm:$0xff]   ;;  %v453_v6 = vld [vmem:[#allocation5 + $0x8] ss:$0 sps:$4 sm:$0xff]   ;;  %v455_v8 = vld [vmem:[#allocation7] sm:$0xff]   ;;  %vm116_vm3 = vcmask 187392  }
  0x4d   :  { %415 = vmatprep.mubr.msk.bf16.mxu0 %vm568_vm1, %v567_v1  ;;  %427 = vmatprep.mubr.msk.bf16.mxu1 %vm568_vm1, %v567_v1  ;;  %v122_v3 = vsel %vm120_vm0, 4294967295, %v569_v2  ;;  %v454_v9 = vld [vmem:[#allocation3] sm:$0xff]   ;;  %v458_v12 = vld [vmem:[#allocation7 + $0x18] sm:$0xff]   ;;  %v459_v13 = vld [vmem:[#allocation8] sm:$0xff]   ;;  %vm210_vm4 = vcmask 523264   ;;  %vm369_vm5 = vcmask 7168  }
  0x4e   :  { %v123_v5 = vsel %vm121_vm2, %v122_v3, 0  ;;  %412 = vmatpush3.bf16.msra.mxu0 %v452_v4  ;;  %v456_v10 = vld [vmem:[#allocation7 + $0x8] sm:$0xff]   ;;  %420 = vmatpush3.bf16.msra.mxu1 %v455_v8  ;;  %v457_v11 = vld [vmem:[#allocation7 + $0x10] sm:$0xff]   ;;  %v462_v26 = vld [vmem:[#allocation8 + $0x18] sm:$0xff]  }
  0x4f   :  { %413 = vmatprep.subr.bf16.mxu0 %v567_v1  ;;  %v125_v7 = vand.u32 %v453_v6, %v123_v5  ;;  %421 = vmatprep.subr.bf16.mxu1 %v567_v1  ;;  %v460_v14 = vld [vmem:[#allocation8 + $0x8] sm:$0xff]   ;;  %v461_v25 = vld [vmem:[#allocation8 + $0x10] sm:$0xff]  }
  0x50   :  { %v379_v15 = vld [vmem:[%s724_s2] ss:$0 sm:$0xff] }
  0x51   :  { %v384_v27 = vld [vmem:[%s726_s4] ss:$0 sm:$0xff] }
  0x52   :  { %414 = vmatpush3.bf16.msra.mxu0 %v125_v7  ;;  %422 = vmatpush3.bf16.msra.mxu1 %v456_v10  ;;  %v390_v37 = vld [vmem:[%s728_s6] ss:$0 sm:$0xff] }
  0x53   :  { %431 = vmatprep.subr.bf16.mxu0 %v567_v1  ;;  %423 = vmatprep.subr.bf16.mxu1 %v567_v1  ;;  %v396_v42 = vld [vmem:[%s729_s7] ss:$0 sm:$0xff] }
  0x54   :  { %v397_v51 = vld [vmem:[#allocation2] ss:$0 sm:$0xff] }
  0x55   :  { %416 = vmatmul.mubr.msk.bf16.vlgmr.msra.gmra.mrb[0].mxu0 %vm116_vm3, %v454_v9 }
  0x56   :  { %439 = vmatprep.mubr.msk.bf16.mxu0 %vm568_vm1, %v567_v1  ;;  %424 = vmatpush3.bf16.msra.mxu1 %v457_v11 }
  0x57   :  { %425 = vmatprep.subr.bf16.mxu1 %v567_v1  ;;  %432 = vmatpush3.bf16.msra.mxu0 %v459_v13 }
  0x58   :  { %433 = vmatprep.subr.bf16.mxu0 %v567_v1 }
  0x5a   :  { %426 = vmatpush3.bf16.msra.mxu1 %v458_v12 }
  0x5b   :  { %434 = vmatpush3.bf16.msra.mxu0 %v460_v14 }
  0x5c   :  { %435 = vmatprep.subr.bf16.mxu0 %v567_v1 }
  0x5f   :  { %436 = vmatpush3.bf16.msra.mxu0 %v461_v25 }
  0x60   :  { %437 = vmatprep.subr.bf16.mxu0 %v567_v1 }
  0x63   :  { %438 = vmatpush3.bf16.msra.mxu0 %v462_v26 }
 0x128   :  { %v161_v16 = vpop.f32.mrb[0].mxu0 }
 0x129   :  { %v162_v17 = vadd.f32 %v379_v15, %v161_v16  ;;  %v417_v18 = vpop.f32.mrb[1].mxu0 }
 0x12a   :  { %v164_v19 = vpop.f32.mrb[2].mxu0 }
 0x12b   :  { %v165_v20 = vadd.f32 %v379_v15, %v164_v19  ;;  %v418_v21 = vpop.f32.mrb[3].mxu0  ;;  %v168_v22 = vmax.f32 %v162_v17, 0.0 }
 0x12d   :  { %v169_v23 = vmax.f32 %v165_v20, 0.0 }
 0x12f   :  { %v170_v24 = vpack.c.bf16 %v169_v23, %v168_v22 }
 0x131   :  { %428 = vmatmul.mubr.msk.bf16.vlgmr.msra.gmra.mrb[0].mxu1 %vm210_vm4, %v170_v24 }
 0x204   :  { %v248_v28 = vpop.f32.mrb[0].mxu1 }
 0x205   :  { %v249_v29 = vadd.f32 %v384_v27, %v248_v28  ;;  %v429_v30 = vpop.f32.mrb[1].mxu1 }
 0x206   :  { %v251_v31 = vpop.f32.mrb[2].mxu1 }
 0x207   :  { %v252_v32 = vadd.f32 %v384_v27, %v251_v31  ;;  %v430_v33 = vpop.f32.mrb[3].mxu1  ;;  %v255_v34 = vmax.f32 %v249_v29, 0.0 }
 0x209   :  { %v256_v35 = vmax.f32 %v252_v32, 0.0 }
 0x20b   :  { %v257_v36 = vpack.c.bf16 %v256_v35, %v255_v34 }
 0x20d   :  { %440 = vmatmul.mubr.msk.bf16.vlgmr.msra.gmra.mrb[4].mxu0 %vm210_vm4, %v257_v36 }
 0x2e0   :  { %v334_v38 = vpop.f32.mrb[4].mxu0 }
 0x2e1   :  { %v335_v39 = vadd.f32 %v390_v37, %v334_v38  ;;  %v441_v40 = vpop.f32.mrb[5].mxu0 }
 0x2e2   :  { %v337_v41 = vpop.f32.mrb[6].mxu0 }
 0x2e3   :  { %v341_v43 = vmax.f32 %v335_v39, 0.0  ;;  %v338_v44 = vadd.f32 %v390_v37, %v337_v41  ;;  %v442_v45 = vpop.f32.mrb[7].mxu0 }
 0x2e5   :  { %v342_v46 = vmax.f32 %v338_v44, 0.0  ;;  %v350_v47 = vmul.f32 %v396_v42, %v341_v43 }
 0x2e7   :  { %v352_v48 = vsel %vm210_vm4, %v350_v47, 0.0  ;;  %v351_v49 = vmul.f32 %v396_v42, %v342_v46 }
 0x2e8   :  { %353 = vadd.xlane.f32.xlu0 %v352_v48 }
 0x2e9   :  { %v355_v50 = vsel %vm210_vm4, %v351_v49, 0.0 }
 0x2ec   :  { %356 = vadd.xlane.f32.xlu0 %v355_v50 }
 0x375   :  { %v354_v52 = vpop.xlane.xlu0 %353 }
 0x376   :  { %v365_v53 = vadd.f32 %v397_v51, %v354_v52 }
 0x378   :  { %463 = vtanh.f32 %v365_v53 }
 0x379   :  { %v357_v54 = vpop.xlane.xlu0 %356 }
 0x37a   :  { %v366_v55 = vadd.f32 %v397_v51, %v357_v54 }
 0x37c   :  { %465 = vtanh.f32 %v366_v55 }
 0x382   :  { %v464_v56 = vpop.eup %463 }
 0x383   :  { %370 = vst.msk [vmem:[%s731_s9] sm:$0xff] %vm369_vm5, %v464_v56 }
 0x386   :  { %v466_v57 = vpop.eup %465 }
 0x387   :  { %371 = vst.msk [vmem:[%s731_s9 + $0x8] sm:$0xff] %vm369_vm5, %v466_v57 }
 0x388   :  { %376 = vsyncpa [#allocation4], 1 }
 0x389   :  { %377 = vsyncpa [#allocation6], 1 }
 0x38a   :  { %378 = vsyncpa [#allocation9], 1 }

</bundles_post_ra>
